<compile_context>
chip_gen: v6e
topology: v6e:2x2x1
jax: 0.10.0
libtpu: 0.0.40
codegen_flags: <defaults>
</compile_context>

<pallas_src>
import jax
import jax.numpy as jnp
from jax.experimental import pallas as pl
from jax.experimental.pallas import tpu as pltpu


def _round_up(x: int, m: int) -> int:
    return ((x + m - 1) // m) * m


# --------------------------------------------------------------------------
# Kernels
# --------------------------------------------------------------------------
def _linear_kernel_single_k(x_ref, w_ref, b_ref, o_ref):
    # x_ref: (tm, Kp)   w_ref: (Kp, tn)   b_ref: (1, tn)   o_ref: (tm, tn) f32
    o_ref[...] = (
        jnp.dot(x_ref[...], w_ref[...], preferred_element_type=jnp.float32)
        + b_ref[...]
    ).astype(o_ref.dtype)


def _linear_kernel_multi_k(x_ref, w_ref, b_ref, o_ref):
    # o_ref (f32) is resident across the K axis; accumulate into it directly.
    k = pl.program_id(2)

    @pl.when(k == 0)
    def _init():
        o_ref[...] = jnp.zeros_like(o_ref)

    o_ref[...] += jnp.dot(
        x_ref[...], w_ref[...], preferred_element_type=jnp.float32
    )

    @pl.when(k == pl.num_programs(2) - 1)
    def _finalize():
        o_ref[...] += b_ref[...]   # bias added once, in the epilogue only


# --------------------------------------------------------------------------
# Wrapper
# --------------------------------------------------------------------------
def prepare_linear_params(weight, bias, compute_dtype=jnp.float32):
    """One-time (init-time) layout prep: (C, D) -> (D, C) transpose + cast.

    Keeps the per-call forward path free of the HBM transpose/cast pass.
    """
    w_t = jnp.asarray(weight, compute_dtype).T          # (D, C): native MXU RHS
    b = jnp.asarray(bias, jnp.float32)                  # (C,)
    return w_t, b


def linear_forward(
    x,
    w_t,
    bias,
    *,
    compute_dtype=jnp.float32,
    tm_max=512,
    tn_max=512,
    tk_max=1024,
    vmem_limit_bytes=48 * 1024 * 1024,
):
    """y = x.astype(compute_dtype) @ W^T + b via a tiled Pallas matmul kernel.

    x:    (B, D)   any real dtype
    w_t:  (D, C)   weight pre-transposed (see prepare_linear_params)
    bias: (C,)
    returns (B, C) float32
    """
    B, D = x.shape
    D2, C = w_t.shape
    assert D2 == D, "weight/input dim mismatch"

    x_c = x.astype(compute_dtype)            # X.float() (or bf16 if requested)
    w_c = w_t.astype(compute_dtype)
    b_c = bias.astype(jnp.float32).reshape(1, C)

    # Tile sizes: sublane-aligned M, 128-lane-aligned N / K.
    tm = min(tm_max, _round_up(B, 8))
    tn = min(tn_max, _round_up(C, 128))
    tk = min(tk_max, _round_up(D, 128))

    Mp = _round_up(B, tm)
    Np = _round_up(C, tn)                     # lane-dense output
    Kp = _round_up(D, tk)

    # v7x has 2 TensorCores: if both parallel axes have a single block, split M.
    if (Mp // tm == 1) and (Np // tn == 1) and tm >= 16:
        tm = _round_up(tm // 2, 8)
        Mp = _round_up(B, tm)

    # Pad only when necessary (jnp.pad materializes a full HBM copy).
    x_p = x_c if (Mp == B and Kp == D) else jnp.pad(x_c, ((0, Mp - B), (0, Kp - D)))
    w_p = w_c if (Kp == D and Np == C) else jnp.pad(w_c, ((0, Kp - D), (0, Np - C)))
    b_p = b_c if Np == C else jnp.pad(b_c, ((0, 0), (0, Np - C)))

    gm, gn, gk = Mp // tm, Np // tn, Kp // tk

    if gk == 1:
        # Small-D fast path (classifier heads): no accumulator plumbing at all.
        out_p = pl.pallas_call(
            _linear_kernel_single_k,
            out_shape=jax.ShapeDtypeStruct((Mp, Np), jnp.float32),
            grid=(gm, gn),
            in_specs=[
                pl.BlockSpec((tm, Kp), lambda i, j: (i, 0)),   # X
                pl.BlockSpec((Kp, tn), lambda i, j: (0, j)),   # W^T (D, C)
                pl.BlockSpec((1, tn), lambda i, j: (0, j)),    # bias
            ],
            out_specs=pl.BlockSpec((tm, tn), lambda i, j: (i, j)),
            compiler_params=pltpu.CompilerParams(
                dimension_semantics=("parallel", "parallel"),
                vmem_limit_bytes=vmem_limit_bytes,
            ),
        )(x_p, w_p, b_p)
    else:
        out_p = pl.pallas_call(
            _linear_kernel_multi_k,
            out_shape=jax.ShapeDtypeStruct((Mp, Np), jnp.float32),
            grid=(gm, gn, gk),
            in_specs=[
                pl.BlockSpec((tm, tk), lambda i, j, k: (i, k)),   # X
                pl.BlockSpec((tk, tn), lambda i, j, k: (k, j)),   # W^T (D, C)
                pl.BlockSpec((1, tn), lambda i, j, k: (0, j)),    # bias
            ],
            out_specs=pl.BlockSpec((tm, tn), lambda i, j, k: (i, j)),
            compiler_params=pltpu.CompilerParams(
                dimension_semantics=("parallel", "parallel", "arbitrary"),
                vmem_limit_bytes=vmem_limit_bytes,
            ),
        )(x_p, w_p, b_p)

    # Slice away lane/sublane padding outside the kernel (only if any).
    if Mp == B and Np == C:
        return out_p
    return out_p[:B, :C]


if __name__ == "__main__":
    # Module config: Linear(input_dim=32, num_classes=2)
    input_dim = 32
    num_classes = 2
    batch = 8

    key = jax.random.PRNGKey(0)
    kx, kw, kb = jax.random.split(key, 3)

    # Deterministic synthetic parameters (mimicking nn.Linear init bounds).
    bound = 1.0 / (input_dim ** 0.5)
    weight = jax.random.uniform(
        kw, (num_classes, input_dim), jnp.float32, minval=-bound, maxval=bound
    )
    bias = jax.random.uniform(
        kb, (num_classes,), jnp.float32, minval=-bound, maxval=bound
    )

    # Example input (forward calls X.float(), so any real dtype is fine).
    x = jax.random.normal(kx, (batch, input_dim), jnp.float32)

    # One-time parameter prep (transpose + cast hoisted out of the call path).
    w_t, b = prepare_linear_params(weight, bias)

    y = jax.block_until_ready(linear_forward(x, w_t, b))

    # Cross-check against plain JAX reference.
    y_ref = x.astype(jnp.float32) @ weight.T + bias
    assert y.shape == (batch, num_classes)
    assert jnp.allclose(y, y_ref, atol=1e-5, rtol=1e-5)

    print("KERNEL_OK")
</pallas_src>

<mosaic_0001>
module attributes {stable_mosaic.version = 11 : i64} {
  func.func @_linear_kernel_single_k(%arg0: i32, %arg1: i32, %arg2: memref<8x128xf32, #tpu.memory_space<vmem>>, %arg3: memref<128x128xf32, #tpu.memory_space<vmem>>, %arg4: memref<1x128xf32, #tpu.memory_space<vmem>>, %arg5: memref<8x128xf32, #tpu.memory_space<vmem>>) attributes {dimension_semantics = [#tpu.dimension_semantics<parallel>, #tpu.dimension_semantics<parallel>], iteration_bounds = array<i64: 1, 1>, scalar_prefetch = 0 : i64, scratch_operands = 0 : i64, tpu.core_type = #tpu.core_type<tc>, window_params = [{transform_indices = @transform_0, window_bounds = array<i64: 8, 128>}, {transform_indices = @transform_1, window_bounds = array<i64: 128, 128>}, {transform_indices = @transform_2, window_bounds = array<i64: 1, 128>}, {transform_indices = @transform_3, window_bounds = array<i64: 8, 128>}]} {
    %c0 = arith.constant 0 : index
    %c0_0 = arith.constant 0 : index
    %0 = vector.load %arg2[%c0, %c0_0] : memref<8x128xf32, #tpu.memory_space<vmem>>, vector<8x128xf32>
    %c0_1 = arith.constant 0 : index
    %c0_2 = arith.constant 0 : index
    %1 = vector.load %arg3[%c0_1, %c0_2] : memref<128x128xf32, #tpu.memory_space<vmem>>, vector<128x128xf32>
    %cst = arith.constant dense<0.000000e+00> : vector<8x128xf32>
    %2 = tpu.matmul %0, %1, %cst {dimension_numbers = #tpu.dot_dimension_numbers<[1], [0], [0], [1], [0, 0, 1, 1], [], []>} : vector<8x128xf32>, vector<128x128xf32>, vector<8x128xf32> -> vector<8x128xf32>
    %c0_3 = arith.constant 0 : index
    %c0_4 = arith.constant 0 : index
    %3 = vector.load %arg4[%c0_3, %c0_4] : memref<1x128xf32, #tpu.memory_space<vmem>>, vector<1x128xf32>
    %4 = vector.broadcast %3 : vector<1x128xf32> to vector<8x128xf32>
    %5 = arith.addf %2, %4 : vector<8x128xf32>
    %c0_5 = arith.constant 0 : index
    %c0_6 = arith.constant 0 : index
    %6 = vector.load %arg5[%c0_5, %c0_6] : memref<8x128xf32, #tpu.memory_space<vmem>>, vector<8x128xf32>
    tpu.vector_store %arg5[%c0_5, %c0_6], %5 {strides = array<i32>} : memref<8x128xf32, #tpu.memory_space<vmem>>, vector<8x128xf32>,
    return
  }
  func.func @transform_0(%arg0: i32, %arg1: i32) -> (i32, i32) {
    %c0_i32 = arith.constant 0 : i32
    %c0_i32_0 = arith.constant 0 : i32
    return %arg0, %c0_i32 : i32, i32
  }
  func.func @transform_1(%arg0: i32, %arg1: i32) -> (i32, i32) {
    %c0_i32 = arith.constant 0 : i32
    %c0_i32_0 = arith.constant 0 : i32
    return %c0_i32, %arg1 : i32, i32
  }
  func.func @transform_2(%arg0: i32, %arg1: i32) -> (i32, i32) {
    %c0_i32 = arith.constant 0 : i32
    %c0_i32_0 = arith.constant 0 : i32
    return %c0_i32, %arg1 : i32, i32
  }
  func.func @transform_3(%arg0: i32, %arg1: i32) -> (i32, i32) {
    %c0_i32 = arith.constant 0 : i32
    return %arg0, %arg1 : i32, i32
  }
}

</mosaic_0001>

<bundles_post_ra>
// kernel: tpu_custom_call.1
= control target key start
LH: loop header
LB: loop body
LE: loop exit
PB: predicated region body
PF: predicated region fallthrough
CT: control target
= control target key end

     0   :  { %8 = vsyncpa [#allocation3], 0  ;;  %s317_s0 = inlined_call_operand.hbm [shape: f32[8,128], index: 0, kind: input, shape index: {}]   ;;  %s318_s1 = inlined_call_operand.hbm [shape: f32[128,128], index: 1, kind: input, shape index: {}]   ;;  %s319_s2 = inlined_call_operand.vmem [shape: f32[1,128], index: 2, kind: input, shape index: {}]   ;;  %s320_s3 = inlined_call_operand.hbm [shape: f32[8,128], index: 3, kind: output, shape index: {}]  }
   0x1   :  { %9 = vsyncpa [#allocation6], 0 }
   0x2   :  { %10 = vsyncpa [#allocation4], 0  ;;  %s278_s12 = smov [#allocation2]   ;;  %s279_s14 = smov [#allocation5]  }
   0x3   :  { %s17_s13 = sshll.u32 %s278_s12, 4  ;;  %s26_s15 = sshll.u32 %s279_s14, 4  ;;  %s18_s13 = int_to_ptr.vmem [resolvable:$true] %s17_s13  ;;  %s27_s15 = int_to_ptr.vmem [resolvable:$true] %s26_s15 }
   0x4   :  { %s220_s16 = scalar_lea.vmem %s18_s13, 128  ;;  %p225_p1 = scmp.lt.s32.totalorder %s18_s13, %s18_s13 }
   0x5   :  { %p221_p0 = scmp.ne.s32.totalorder %s18_s13, %s220_s16  ;;  %p226_p2 = scmp.lt.s32.totalorder %s220_s16, %s220_s16 }
   0x7   :  { %p227_p3 = por %p226_p2, %p225_p1 }
   0x9   :  { %p228_p4 = pnand %p227_p3, %p221_p0 }
   0xb   :  { %231 = shalt.err (!%p228_p4)
}
   0xc   :  { %20 = dma.hbm_to_vmem [thread:$0]  %s317_s0, 128, %s18_s13, [#allocation3]  }
   0xd   :  { %s240_s19 = scalar_lea.vmem %s27_s15, 2048  ;;  %p245_p6 = scmp.lt.s32.totalorder %s27_s15, %s27_s15 }
   0xe   :  { %p241_p5 = scmp.ne.s32.totalorder %s27_s15, %s240_s19  ;;  %p246_p7 = scmp.lt.s32.totalorder %s240_s19, %s240_s19 }
  0x10   :  { %p247_p8 = por %p246_p7, %p245_p6 }
  0x12   :  { %p248_p9 = pnand %p247_p8, %p241_p5 }
  0x14   :  { %251 = shalt.err (!%p248_p9)
}
  0x15   :  { %s280_s20 = smov 128   ;;  %s281_s21 = smov 8  }
  0x16   :  { %32 = dma.hbm_to_vmem [thread:$0]  %s318_s1, 2048, %s27_s15, [#allocation6], %s280_s20, %s280_s20, %s281_s21  }
  0x17   :  { %272 = dma.done.wait [#allocation3], 128  }
  0x18   :  { %273 = vsyncadd [#allocation3], 4294967168 }
  0x19   :  { %274 = dma.done.wait [#allocation6], 2048  }
  0x1a   :  { %275 = vsyncadd [#allocation6], 4294965248  ;;  %v282_v0 = vmov 0.0   ;;  %vm283_vm0 = vmmov 0   ;;  %v57_v1 = vld [vmem:[#allocation5 + $0x78] sm:$0xff]  ;;  %v56_v2 = vld [vmem:[#allocation5 + $0x70] sm:$0xff] }
  0x1b   :  { %170 = vmatprep.subr.mxu0 %v282_v0  ;;  %202 = vmatprep.mubr.msk.f32.mxu0 %vm283_vm0, %v282_v0  ;;  %v55_v3 = vld [vmem:[#allocation5 + $0x68] sm:$0xff]  ;;  %v54_v4 = vld [vmem:[#allocation5 + $0x60] sm:$0xff]  ;;  %v53_v5 = vld [vmem:[#allocation5 + $0x58] sm:$0xff]  ;;  %s284_s24 = smov [#allocation7]  }
  0x1c   :  { %171 = vmatpush3.msra.mxu0 %v57_v1  ;;  %v52_v6 = vld [vmem:[#allocation5 + $0x50] sm:$0xff]  ;;  %v51_v7 = vld [vmem:[#allocation5 + $0x48] sm:$0xff]  ;;  %v50_v8 = vld [vmem:[#allocation5 + $0x40] sm:$0xff]  ;;  %s142_s25 = sshll.u32 %s284_s24, 4  ;;  %s143_s25 = int_to_ptr.vmem [resolvable:$true] %s142_s25 }
  0x1d   :  { %172 = vmatprep.subr.mxu0 %v282_v0  ;;  %v49_v9 = vld [vmem:[#allocation5 + $0x38] sm:$0xff]  ;;  %v48_v10 = vld [vmem:[#allocation5 + $0x30] sm:$0xff]  ;;  %v47_v11 = vld [vmem:[#allocation5 + $0x28] sm:$0xff]  ;;  %s252_s26 = scalar_lea.vmem %s143_s25, 128  ;;  %p257_p11 = scmp.lt.s32.totalorder %s143_s25, %s143_s25 }
  0x1e   :  { %173 = vmatpush3.msra.mxu0 %v56_v2  ;;  %v46_v12 = vld [vmem:[#allocation5 + $0x20] sm:$0xff]  ;;  %v45_v13 = vld [vmem:[#allocation5 + $0x18] sm:$0xff]  ;;  %v44_v14 = vld [vmem:[#allocation5 + $0x10] sm:$0xff]  ;;  %p253_p10 = scmp.ne.s32.totalorder %s143_s25, %s252_s26  ;;  %p258_p12 = scmp.lt.s32.totalorder %s252_s26, %s252_s26 }
  0x1f   :  { %174 = vmatprep.subr.mxu0 %v282_v0  ;;  %v43_v15 = vld [vmem:[#allocation5 + $0x8] sm:$0xff]  ;;  %v42_v16 = vld [vmem:[#allocation5] sm:$0xff]  ;;  %v41_v17 = vld [vmem:[#allocation2] sm:$0xff] }
  0x20   :  { %175 = vmatpush3.msra.mxu0 %v55_v3  ;;  %v152_v18 = vld [vmem:[%s319_s2] ss:$0 sm:$0xff]  ;;  %p259_p13 = por %p258_p12, %p257_p11 }
  0x21   :  { %176 = vmatprep.subr.mxu0 %v282_v0 }
  0x22   :  { %177 = vmatpush3.msra.mxu0 %v54_v4  ;;  %p260_p0 = pnand %p259_p13, %p253_p10 }
  0x23   :  { %178 = vmatprep.subr.mxu0 %v282_v0 }
  0x24   :  { %179 = vmatpush3.msra.mxu0 %v53_v5 }
  0x25   :  { %180 = vmatprep.subr.mxu0 %v282_v0 }
  0x26   :  { %181 = vmatpush3.msra.mxu0 %v52_v6 }
  0x27   :  { %182 = vmatprep.subr.mxu0 %v282_v0 }
  0x28   :  { %183 = vmatpush3.msra.mxu0 %v51_v7 }
  0x29   :  { %184 = vmatprep.subr.mxu0 %v282_v0 }
  0x2a   :  { %185 = vmatpush3.msra.mxu0 %v50_v8 }
  0x2b   :  { %186 = vmatprep.subr.mxu0 %v282_v0 }
  0x2c   :  { %187 = vmatpush3.msra.mxu0 %v49_v9 }
  0x2d   :  { %188 = vmatprep.subr.mxu0 %v282_v0 }
  0x2e   :  { %189 = vmatpush3.msra.mxu0 %v48_v10 }
  0x2f   :  { %190 = vmatprep.subr.mxu0 %v282_v0 }
  0x30   :  { %191 = vmatpush3.msra.mxu0 %v47_v11 }
  0x31   :  { %192 = vmatprep.subr.mxu0 %v282_v0 }
  0x32   :  { %193 = vmatpush3.msra.mxu0 %v46_v12 }
  0x33   :  { %194 = vmatprep.subr.mxu0 %v282_v0 }
  0x34   :  { %195 = vmatpush3.msra.mxu0 %v45_v13 }
  0x35   :  { %196 = vmatprep.subr.mxu0 %v282_v0 }
  0x36   :  { %197 = vmatpush3.msra.mxu0 %v44_v14 }
  0x37   :  { %198 = vmatprep.subr.mxu0 %v282_v0 }
  0x38   :  { %199 = vmatpush3.msra.mxu0 %v43_v15 }
  0x39   :  { %200 = vmatprep.subr.mxu0 %v282_v0 }
  0x3a   :  { %201 = vmatpush3.msra.mxu0 %v42_v16 }
  0x3b   :  { %203 = vmatmul.mubr.f32.vlgmr.msra.gmra.mxu0 %v41_v17 }
  0xfb   :  { %v131_v19 = vpop.f32.mrf.mxu0 }
  0xfc   :  { %v132_v20 = vadd.f32 %v152_v18, %v131_v19 }
  0xfd   :  { %v204_v21 = vpop.f32.mrf.mxu0 }
  0xfe   :  { %135 = vst [vmem:[#allocation7] sm:$0xff] %v132_v20 }
  0xff   :  { %263 = shalt.err (!%p260_p0)
}
 0x100   :  { %145 = dma.vmem_to_hbm [thread:$0]  %s143_s25, 128, %s320_s3, [#allocation4]  }
 0x101   :  { %276 = dma.done.wait [#allocation4], 128  }
 0x102   :  { %277 = vsyncadd [#allocation4], 4294967168 }
 0x103   :  { %149 = vsyncpa [#allocation3], 1 }
 0x104   :  { %150 = vsyncpa [#allocation6], 1 }
 0x105   :  { %151 = vsyncpa [#allocation4], 1 }

</bundles_post_ra>
